<compile_context>
chip_gen: v7x
topology: tpu7x:2x2x1
jax: 0.10.0
libtpu: 0.0.40
codegen_flags: <defaults>
</compile_context>

<pallas_src>
import functools
from typing import NamedTuple

import numpy as np

import jax
import jax.numpy as jnp
from jax.experimental import pallas as pl
from jax.experimental.pallas import tpu as pltpu


# ----------------------------------------------------------------------------
# Static layout of the packed parameter slabs
# ----------------------------------------------------------------------------
class _LayerMeta(NamedTuple):
    big: bool        # True -> weight lives in the bf16 slab, else the f32 slab
    off: int         # row offset of the weight inside its slab
    in_dim: int
    out_dim: int


class _Layout(NamedTuple):
    metas: tuple     # 18 entries: fc1..fc8, fused(fc91|fc92), fc10..fc18
    big_rows: int
    big_cols: int
    small_rows: int
    small_cols: int
    bias_cols: int


def _build_layout(in_size):
    enc = [in_size // (2 ** i) for i in range(9)]          # in_size, in/2, ..., in/256
    dec = [2] + enc[::-1]                                  # 2, in/256, ..., in
    dims = [(enc[i], enc[i + 1]) for i in range(8)]        # fc1..fc8
    dims.append((enc[8], 4))                               # fused fc91|fc92 head -> (B, 4)
    dims += [(dec[i], dec[i + 1]) for i in range(9)]       # fc10..fc18
    metas = []
    big_off = 0
    small_off = 0
    for k, n in dims:
        big = min(k, n) >= 64                              # fc1, fc2, fc17, fc18
        if big:
            metas.append(_LayerMeta(True, big_off, k, n))
            big_off += -(-k // 16) * 16                    # bf16 sublane tile = 16 rows
        else:
            metas.append(_LayerMeta(False, small_off, k, n))
            small_off += -(-k // 8) * 8                    # f32 sublane tile = 8 rows
    big_cols = max([m.out_dim for m in metas if m.big] + [128])
    small_cols = max([m.out_dim for m in metas if not m.big] + [8])
    bias_cols = max(m.out_dim for m in metas)
    return _Layout(tuple(metas), max(big_off, 16), big_cols,
                   max(small_off, 8), small_cols, bias_cols)


# ----------------------------------------------------------------------------
# Fused Pallas kernel
# ----------------------------------------------------------------------------
def _vae_fused_kernel(x_ref, eps_ref, bigw_ref, smallw_ref, bias_ref,
                      zlab_ref, recon_ref, *, metas):
    def dense(h, li, relu):
        meta = metas[li]
        k, n = meta.in_dim, meta.out_dim
        b = bias_ref[li:li + 1, 0:n]                       # (1, n) -> broadcasts over batch
        if meta.big:
            # bf16 MXU path with f32 accumulation (fc1, fc2, fc17, fc18).
            w = bigw_ref[meta.off:meta.off + k, 0:n]
            y = jnp.dot(h.astype(jnp.bfloat16), w,
                        preferred_element_type=jnp.float32)
        else:
            w = smallw_ref[meta.off:meta.off + k, 0:n]
            y = jnp.dot(h, w, preferred_element_type=jnp.float32)
        y = y + b
        return jnp.maximum(y, 0.0) if relu else y

    # ---------------- encoder: fc1..fc8 with ReLU ----------------
    h = x_ref[...]
    for li in range(8):
        h = dense(h, li, relu=True)

    # ---------------- fused latent heads: one (B,4) matmul ----------------
    head = dense(h, 8, relu=False)
    mu = head[:, 0:2]
    logvar = head[:, 2:4]

    # ---------------- reparametrize + softmax label (f32) ----------------
    std = jnp.exp(0.5 * logvar)
    z = eps_ref[...] * std + mu

    zmax = jnp.max(z, axis=1, keepdims=True)
    e = jnp.exp(z - zmax)
    label = e / jnp.sum(e, axis=1, keepdims=True)

    # single merged small output: cols 0:2 = z, cols 2:4 = softmax(z)
    zlab_ref[...] = jnp.concatenate([z, label], axis=1)

    # ---------------- decoder: fc10..fc17 ReLU, fc18 sigmoid ----------------
    d = z
    for li in range(9, 17):
        d = dense(d, li, relu=True)
    recon_ref[...] = jax.nn.sigmoid(dense(d, 17, relu=False))


# ----------------------------------------------------------------------------
# Parameter init (mimics nn.Linear default U(-1/sqrt(in), 1/sqrt(in)))
# ----------------------------------------------------------------------------
def init_vae_params(key, xn, yn):
    in_size = xn * yn
    enc = [in_size // (2 ** i) for i in range(9)]
    dec = [2] + enc[::-1]
    layer_io = {f"fc{i + 1}": (enc[i], enc[i + 1]) for i in range(8)}
    layer_io["fc91"] = (enc[8], 2)
    layer_io["fc92"] = (enc[8], 2)
    for i in range(9):
        layer_io[f"fc{10 + i}"] = (dec[i], dec[i + 1])

    params = {}
    keys = jax.random.split(key, len(layer_io))
    for k_, (name, (i, o)) in zip(keys, layer_io.items()):
        kw, kb = jax.random.split(k_)
        bound = 1.0 / float(i) ** 0.5
        # stored (in, out): transpose of PyTorch's (out, in), so forward is y = x @ W + b
        w = jax.random.uniform(kw, (i, o), jnp.float32, -bound, bound)
        b = jax.random.uniform(kb, (o,), jnp.float32, -bound, bound)
        params[name] = (w, b)
    return params


# ----------------------------------------------------------------------------
# One-time host-side packing into the three DMA slabs
# ----------------------------------------------------------------------------
def pack_vae_params(params, in_size):
    lay = _build_layout(in_size)
    w91, b91 = params["fc91"]
    w92, b92 = params["fc92"]
    per_layer = (
        [params[f"fc{i}"] for i in range(1, 9)]
        + [(jnp.concatenate([w91, w92], axis=1),            # fused (1, 4) head
            jnp.concatenate([b91, b92], axis=0))]
        + [params[f"fc{i}"] for i in range(10, 19)]
    )

    big = np.zeros((lay.big_rows, lay.big_cols), np.float32)
    small = np.zeros((lay.small_rows, lay.small_cols), np.float32)
    bias = np.zeros((len(lay.metas), lay.bias_cols), np.float32)
    for li, (meta, (w, b)) in enumerate(zip(lay.metas, per_layer)):
        w = np.asarray(w, np.float32)
        b = np.asarray(b, np.float32).reshape(-1)
        dst = big if meta.big else small
        dst[meta.off:meta.off + meta.in_dim, :meta.out_dim] = w
        bias[li, :meta.out_dim] = b

    return {
        "big_w": jnp.asarray(big).astype(jnp.bfloat16),   # bf16 halves the big-weight DMA bytes
        "small_w": jnp.asarray(small),
        "bias": jnp.asarray(bias),
    }


# ----------------------------------------------------------------------------
# Forward pass wrapper (single fused, grid-less pallas_call; 5 inputs, 2 outputs)
# ----------------------------------------------------------------------------
def vae_forward(packed, x, eps, *, in_size):
    lay = _build_layout(in_size)
    B = x.shape[0]
    # Pad batch to a multiple of 16 so the bf16 LHS of the big layers is sublane-dense.
    B_pad = max(16, ((B + 15) // 16) * 16)
    if B_pad != B:
        x = jnp.pad(x, ((0, B_pad - B), (0, 0)))
        eps = jnp.pad(eps, ((0, B_pad - B), (0, 0)))

    vmem = pl.BlockSpec(memory_space=pltpu.MemorySpace.VMEM)
    kernel = functools.partial(_vae_fused_kernel, metas=lay.metas)

    zlab, recon = pl.pallas_call(
        kernel,
        out_shape=(
            jax.ShapeDtypeStruct((B_pad, 4), jnp.float32),        # [z | softmax(z)]
            jax.ShapeDtypeStruct((B_pad, in_size), jnp.float32),  # reconstruction
        ),
        in_specs=[vmem] * 5,
        out_specs=(vmem, vmem),
    )(x, eps, packed["big_w"], packed["small_w"], packed["bias"])

    z = zlab[:B, 0:2]
    label = zlab[:B, 2:4]
    return z, recon[:B], label


# ----------------------------------------------------------------------------
# Main
# ----------------------------------------------------------------------------
if __name__ == "__main__":
    xn, yn = 16, 16            # inSize = 256
    batch = 2
    in_size = xn * yn

    key = jax.random.PRNGKey(0)
    k_params, k_x, k_eps = jax.random.split(key, 3)

    params = init_vae_params(k_params, xn, yn)
    packed = pack_vae_params(params, in_size)               # packed once, reused every call

    x = jax.random.uniform(k_x, (batch, in_size), jnp.float32)   # flattened image
    eps = jax.random.normal(k_eps, (batch, 2), jnp.float32)      # reparam noise

    fwd = jax.jit(functools.partial(vae_forward, in_size=in_size))
    z, recon, label = fwd(packed, x, eps)
    jax.block_until_ready((z, recon, label))

    assert z.shape == (batch, 2)
    assert recon.shape == (batch, in_size)
    assert label.shape == (batch, 2)
    assert jnp.all(jnp.isfinite(z)) and jnp.all(jnp.isfinite(recon)) and jnp.all(jnp.isfinite(label))
    assert jnp.all(recon >= 0.0) and jnp.all(recon <= 1.0)
    # softmax rows sum to 1
    assert jnp.allclose(jnp.sum(label, axis=1), 1.0, atol=1e-5)
    print("KERNEL_OK")
</pallas_src>

<mosaic_0001>
module attributes {stable_mosaic.version = 11 : i64} {
  func.func @_vae_fused_kernel(%arg0: memref<16x256xf32, #tpu.memory_space<vmem>>, %arg1: memref<16x2xf32, #tpu.memory_space<vmem>>, %arg2: memref<576x256xbf16, #tpu.memory_space<vmem>>, %arg3: memref<232x64xf32, #tpu.memory_space<vmem>>, %arg4: memref<18x256xf32, #tpu.memory_space<vmem>>, %arg5: memref<16x4xf32, #tpu.memory_space<vmem>>, %arg6: memref<16x256xf32, #tpu.memory_space<vmem>>) attributes {dimension_semantics = [], scalar_prefetch = 0 : i64, scratch_operands = 0 : i64, tpu.core_type = #tpu.core_type<tc>} {
    %c0 = arith.constant 0 : index
    %c0_0 = arith.constant 0 : index
    %0 = vector.load %arg0[%c0, %c0_0] : memref<16x256xf32, #tpu.memory_space<vmem>>, vector<16x256xf32>
    %c0_1 = arith.constant 0 : index
    %c0_2 = arith.constant 0 : index
    %1 = vector.load %arg4[%c0_1, %c0_2] : memref<18x256xf32, #tpu.memory_space<vmem>>, vector<1x128xf32>
    %c0_3 = arith.constant 0 : index
    %c0_4 = arith.constant 0 : index
    %2 = vector.load %arg2[%c0_3, %c0_4] : memref<576x256xbf16, #tpu.memory_space<vmem>>, vector<256x128xbf16>
    %3 = arith.truncf %0 : vector<16x256xf32> to vector<16x256xbf16>
    %cst = arith.constant dense<0.000000e+00> : vector<16x128xf32>
    %4 = tpu.matmul %3, %2, %cst {dimension_numbers = #tpu.dot_dimension_numbers<[1], [0], [0], [1], [0, 0, 1, 1], [], []>} : vector<16x256xbf16>, vector<256x128xbf16>, vector<16x128xf32> -> vector<16x128xf32>
    %5 = vector.broadcast %1 : vector<1x128xf32> to vector<16x128xf32>
    %6 = arith.addf %4, %5 : vector<16x128xf32>
    %cst_5 = arith.constant 0.000000e+00 : f32
    %7 = vector.broadcast %cst_5 : f32 to vector<16x128xf32>
    %8 = arith.maximumf %6, %7 : vector<16x128xf32>
    %c1 = arith.constant 1 : index
    %c0_6 = arith.constant 0 : index
    %9 = vector.load %arg4[%c1, %c0_6] : memref<18x256xf32, #tpu.memory_space<vmem>>, vector<1x64xf32>
    %c256 = arith.constant 256 : index
    %c0_7 = arith.constant 0 : index
    %10 = vector.load %arg2[%c256, %c0_7] : memref<576x256xbf16, #tpu.memory_space<vmem>>, vector<128x64xbf16>
    %11 = arith.truncf %8 : vector<16x128xf32> to vector<16x128xbf16>
    %cst_8 = arith.constant dense<0.000000e+00> : vector<16x64xf32>
    %12 = tpu.matmul %11, %10, %cst_8 {dimension_numbers = #tpu.dot_dimension_numbers<[1], [0], [0], [1], [0, 0, 1, 1], [], []>} : vector<16x128xbf16>, vector<128x64xbf16>, vector<16x64xf32> -> vector<16x64xf32>
    %13 = vector.broadcast %9 : vector<1x64xf32> to vector<16x64xf32>
    %14 = arith.addf %12, %13 : vector<16x64xf32>
    %cst_9 = arith.constant 0.000000e+00 : f32
    %15 = vector.broadcast %cst_9 : f32 to vector<16x64xf32>
    %16 = arith.maximumf %14, %15 : vector<16x64xf32>
    %c2 = arith.constant 2 : index
    %c0_10 = arith.constant 0 : index
    %17 = vector.load %arg4[%c2, %c0_10] : memref<18x256xf32, #tpu.memory_space<vmem>>, vector<1x32xf32>
    %c0_11 = arith.constant 0 : index
    %c0_12 = arith.constant 0 : index
    %18 = vector.load %arg3[%c0_11, %c0_12] : memref<232x64xf32, #tpu.memory_space<vmem>>, vector<64x32xf32>
    %cst_13 = arith.constant dense<0.000000e+00> : vector<16x32xf32>
    %19 = tpu.matmul %16, %18, %cst_13 {dimension_numbers = #tpu.dot_dimension_numbers<[1], [0], [0], [1], [0, 0, 1, 1], [], []>} : vector<16x64xf32>, vector<64x32xf32>, vector<16x32xf32> -> vector<16x32xf32>
    %20 = vector.broadcast %17 : vector<1x32xf32> to vector<16x32xf32>
    %21 = arith.addf %19, %20 : vector<16x32xf32>
    %cst_14 = arith.constant 0.000000e+00 : f32
    %22 = vector.broadcast %cst_14 : f32 to vector<16x32xf32>
    %23 = arith.maximumf %21, %22 : vector<16x32xf32>
    %c3 = arith.constant 3 : index
    %c0_15 = arith.constant 0 : index
    %24 = vector.load %arg4[%c3, %c0_15] : memref<18x256xf32, #tpu.memory_space<vmem>>, vector<1x16xf32>
    %c64 = arith.constant 64 : index
    %c0_16 = arith.constant 0 : index
    %25 = vector.load %arg3[%c64, %c0_16] : memref<232x64xf32, #tpu.memory_space<vmem>>, vector<32x16xf32>
    %cst_17 = arith.constant dense<0.000000e+00> : vector<16x16xf32>
    %26 = tpu.matmul %23, %25, %cst_17 {dimension_numbers = #tpu.dot_dimension_numbers<[1], [0], [0], [1], [0, 0, 1, 1], [], []>} : vector<16x32xf32>, vector<32x16xf32>, vector<16x16xf32> -> vector<16x16xf32>
    %27 = vector.broadcast %24 : vector<1x16xf32> to vector<16x16xf32>
    %28 = arith.addf %26, %27 : vector<16x16xf32>
    %cst_18 = arith.constant 0.000000e+00 : f32
    %29 = vector.broadcast %cst_18 : f32 to vector<16x16xf32>
    %30 = arith.maximumf %28, %29 : vector<16x16xf32>
    %c4 = arith.constant 4 : index
    %c0_19 = arith.constant 0 : index
    %31 = vector.load %arg4[%c4, %c0_19] : memref<18x256xf32, #tpu.memory_space<vmem>>, vector<1x8xf32>
    %c96 = arith.constant 96 : index
    %c0_20 = arith.constant 0 : index
    %32 = vector.load %arg3[%c96, %c0_20] : memref<232x64xf32, #tpu.memory_space<vmem>>, vector<16x8xf32>
    %cst_21 = arith.constant dense<0.000000e+00> : vector<16x8xf32>
    %33 = tpu.matmul %30, %32, %cst_21 {dimension_numbers = #tpu.dot_dimension_numbers<[1], [0], [0], [1], [0, 0, 1, 1], [], []>} : vector<16x16xf32>, vector<16x8xf32>, vector<16x8xf32> -> vector<16x8xf32>
    %34 = vector.broadcast %31 : vector<1x8xf32> to vector<16x8xf32>
    %35 = arith.addf %33, %34 : vector<16x8xf32>
    %cst_22 = arith.constant 0.000000e+00 : f32
    %36 = vector.broadcast %cst_22 : f32 to vector<16x8xf32>
    %37 = arith.maximumf %35, %36 : vector<16x8xf32>
    %c5 = arith.constant 5 : index
    %c0_23 = arith.constant 0 : index
    %38 = vector.load %arg4[%c5, %c0_23] : memref<18x256xf32, #tpu.memory_space<vmem>>, vector<1x4xf32>
    %c112 = arith.constant 112 : index
    %c0_24 = arith.constant 0 : index
    %39 = vector.load %arg3[%c112, %c0_24] : memref<232x64xf32, #tpu.memory_space<vmem>>, vector<8x4xf32>
    %cst_25 = arith.constant dense<0.000000e+00> : vector<16x4xf32>
    %40 = tpu.matmul %37, %39, %cst_25 {dimension_numbers = #tpu.dot_dimension_numbers<[1], [0], [0], [1], [0, 0, 1, 1], [], []>} : vector<16x8xf32>, vector<8x4xf32>, vector<16x4xf32> -> vector<16x4xf32>
    %41 = vector.broadcast %38 : vector<1x4xf32> to vector<16x4xf32>
    %42 = arith.addf %40, %41 : vector<16x4xf32>
    %cst_26 = arith.constant 0.000000e+00 : f32
    %43 = vector.broadcast %cst_26 : f32 to vector<16x4xf32>
    %44 = arith.maximumf %42, %43 : vector<16x4xf32>
    %c6 = arith.constant 6 : index
    %c0_27 = arith.constant 0 : index
    %45 = vector.load %arg4[%c6, %c0_27] : memref<18x256xf32, #tpu.memory_space<vmem>>, vector<1x2xf32>
    %c120 = arith.constant 120 : index
    %c0_28 = arith.constant 0 : index
    %46 = vector.load %arg3[%c120, %c0_28] : memref<232x64xf32, #tpu.memory_space<vmem>>, vector<4x2xf32>
    %cst_29 = arith.constant dense<0.000000e+00> : vector<16x2xf32>
    %47 = tpu.matmul %44, %46, %cst_29 {dimension_numbers = #tpu.dot_dimension_numbers<[1], [0], [0], [1], [0, 0, 1, 1], [], []>} : vector<16x4xf32>, vector<4x2xf32>, vector<16x2xf32> -> vector<16x2xf32>
    %48 = vector.broadcast %45 : vector<1x2xf32> to vector<16x2xf32>
    %49 = arith.addf %47, %48 : vector<16x2xf32>
    %cst_30 = arith.constant 0.000000e+00 : f32
    %50 = vector.broadcast %cst_30 : f32 to vector<16x2xf32>
    %51 = arith.maximumf %49, %50 : vector<16x2xf32>
    %c7 = arith.constant 7 : index
    %c0_31 = arith.constant 0 : index
    %52 = vector.load %arg4[%c7, %c0_31] : memref<18x256xf32, #tpu.memory_space<vmem>>, vector<1x1xf32>
    %c128 = arith.constant 128 : index
    %c0_32 = arith.constant 0 : index
    %53 = vector.load %arg3[%c128, %c0_32] : memref<232x64xf32, #tpu.memory_space<vmem>>, vector<2x1xf32>
    %cst_33 = arith.constant dense<0.000000e+00> : vector<16x1xf32>
    %54 = tpu.matmul %51, %53, %cst_33 {dimension_numbers = #tpu.dot_dimension_numbers<[1], [0], [0], [1], [0, 0, 1, 1], [], []>} : vector<16x2xf32>, vector<2x1xf32>, vector<16x1xf32> -> vector<16x1xf32>
    %55 = vector.broadcast %52 : vector<1x1xf32> to vector<16x1xf32>
    %56 = arith.addf %54, %55 : vector<16x1xf32>
    %cst_34 = arith.constant 0.000000e+00 : f32
    %57 = vector.broadcast %cst_34 : f32 to vector<16x1xf32>
    %58 = arith.maximumf %56, %57 : vector<16x1xf32>
    %c8 = arith.constant 8 : index
    %c0_35 = arith.constant 0 : index
    %59 = vector.load %arg4[%c8, %c0_35] : memref<18x256xf32, #tpu.memory_space<vmem>>, vector<1x4xf32>
    %c136 = arith.constant 136 : index
    %c0_36 = arith.constant 0 : index
    %60 = vector.load %arg3[%c136, %c0_36] : memref<232x64xf32, #tpu.memory_space<vmem>>, vector<1x4xf32>
    %cst_37 = arith.constant dense<0.000000e+00> : vector<16x4xf32>
    %61 = tpu.matmul %58, %60, %cst_37 {dimension_numbers = #tpu.dot_dimension_numbers<[1], [0], [0], [1], [0, 0, 1, 1], [], []>} : vector<16x1xf32>, vector<1x4xf32>, vector<16x4xf32> -> vector<16x4xf32>
    %62 = vector.broadcast %59 : vector<1x4xf32> to vector<16x4xf32>
    %63 = arith.addf %61, %62 : vector<16x4xf32>
    %64 = vector.extract_strided_slice %63 {offsets = [0, 0], sizes = [16, 2], strides = [1, 1]} : vector<16x4xf32> to vector<16x2xf32>
    %65 = vector.extract_strided_slice %63 {offsets = [0, 2], sizes = [16, 2], strides = [1, 1]} : vector<16x4xf32> to vector<16x2xf32>
    %cst_38 = arith.constant 5.000000e-01 : f32
    %66 = vector.broadcast %cst_38 : f32 to vector<16x2xf32>
    %67 = arith.mulf %66, %65 : vector<16x2xf32>
    %68 = math.exp %67 : vector<16x2xf32>
    %c0_39 = arith.constant 0 : index
    %c0_40 = arith.constant 0 : index
    %69 = vector.load %arg1[%c0_39, %c0_40] : memref<16x2xf32, #tpu.memory_space<vmem>>, vector<16x2xf32>
    %70 = arith.mulf %69, %68 : vector<16x2xf32>
    %71 = arith.addf %70, %64 : vector<16x2xf32>
    %cst_41 = arith.constant dense<0xFF800000> : vector<16xf32>
    %72 = vector.multi_reduction <maximumf>, %71, %cst_41 [1] : vector<16x2xf32> to vector<16xf32>
    %73 = vector.shape_cast %72 : vector<16xf32> to vector<16x1xf32>
    %74 = vector.broadcast %73 : vector<16x1xf32> to vector<16x2xf32>
    %75 = arith.subf %71, %74 : vector<16x2xf32>
    %76 = math.exp %75 : vector<16x2xf32>
    %cst_42 = arith.constant dense<0.000000e+00> : vector<16xf32>
    %77 = vector.multi_reduction <add>, %76, %cst_42 [1] : vector<16x2xf32> to vector<16xf32>
    %78 = vector.shape_cast %77 : vector<16xf32> to vector<16x1xf32>
    %79 = vector.broadcast %78 : vector<16x1xf32> to vector<16x2xf32>
    %80 = arith.divf %76, %79 : vector<16x2xf32>
    %81 = tpu.concatenate %71, %80 in 1 : vector<16x2xf32>, vector<16x2xf32> -> vector<16x4xf32>
    %c0_43 = arith.constant 0 : index
    %c0_44 = arith.constant 0 : index
    %82 = vector.load %arg5[%c0_43, %c0_44] : memref<16x4xf32, #tpu.memory_space<vmem>>, vector<16x4xf32>
    tpu.vector_store %arg5[%c0_43, %c0_44], %81 {strides = array<i32>} : memref<16x4xf32, #tpu.memory_space<vmem>>, vector<16x4xf32>,
    %c9 = arith.constant 9 : index
    %c0_45 = arith.constant 0 : index
    %83 = vector.load %arg4[%c9, %c0_45] : memref<18x256xf32, #tpu.memory_space<vmem>>, vector<1x1xf32>
    %c144 = arith.constant 144 : index
    %c0_46 = arith.constant 0 : index
    %84 = vector.load %arg3[%c144, %c0_46] : memref<232x64xf32, #tpu.memory_space<vmem>>, vector<2x1xf32>
    %cst_47 = arith.constant dense<0.000000e+00> : vector<16x1xf32>
    %85 = tpu.matmul %71, %84, %cst_47 {dimension_numbers = #tpu.dot_dimension_numbers<[1], [0], [0], [1], [0, 0, 1, 1], [], []>} : vector<16x2xf32>, vector<2x1xf32>, vector<16x1xf32> -> vector<16x1xf32>
    %86 = vector.broadcast %83 : vector<1x1xf32> to vector<16x1xf32>
    %87 = arith.addf %85, %86 : vector<16x1xf32>
    %cst_48 = arith.constant 0.000000e+00 : f32
    %88 = vector.broadcast %cst_48 : f32 to vector<16x1xf32>
    %89 = arith.maximumf %87, %88 : vector<16x1xf32>
    %c10 = arith.constant 10 : index
    %c0_49 = arith.constant 0 : index
    %90 = vector.load %arg4[%c10, %c0_49] : memref<18x256xf32, #tpu.memory_space<vmem>>, vector<1x2xf32>
    %c152 = arith.constant 152 : index
    %c0_50 = arith.constant 0 : index
    %91 = vector.load %arg3[%c152, %c0_50] : memref<232x64xf32, #tpu.memory_space<vmem>>, vector<1x2xf32>
    %cst_51 = arith.constant dense<0.000000e+00> : vector<16x2xf32>
    %92 = tpu.matmul %89, %91, %cst_51 {dimension_numbers = #tpu.dot_dimension_numbers<[1], [0], [0], [1], [0, 0, 1, 1], [], []>} : vector<16x1xf32>, vector<1x2xf32>, vector<16x2xf32> -> vector<16x2xf32>
    %93 = vector.broadcast %90 : vector<1x2xf32> to vector<16x2xf32>
    %94 = arith.addf %92, %93 : vector<16x2xf32>
    %cst_52 = arith.constant 0.000000e+00 : f32
    %95 = vector.broadcast %cst_52 : f32 to vector<16x2xf32>
    %96 = arith.maximumf %94, %95 : vector<16x2xf32>
    %c11 = arith.constant 11 : index
    %c0_53 = arith.constant 0 : index
    %97 = vector.load %arg4[%c11, %c0_53] : memref<18x256xf32, #tpu.memory_space<vmem>>, vector<1x4xf32>
    %c160 = arith.constant 160 : index
    %c0_54 = arith.constant 0 : index
    %98 = vector.load %arg3[%c160, %c0_54] : memref<232x64xf32, #tpu.memory_space<vmem>>, vector<2x4xf32>
    %cst_55 = arith.constant dense<0.000000e+00> : vector<16x4xf32>
    %99 = tpu.matmul %96, %98, %cst_55 {dimension_numbers = #tpu.dot_dimension_numbers<[1], [0], [0], [1], [0, 0, 1, 1], [], []>} : vector<16x2xf32>, vector<2x4xf32>, vector<16x4xf32> -> vector<16x4xf32>
    %100 = vector.broadcast %97 : vector<1x4xf32> to vector<16x4xf32>
    %101 = arith.addf %99, %100 : vector<16x4xf32>
    %cst_56 = arith.constant 0.000000e+00 : f32
    %102 = vector.broadcast %cst_56 : f32 to vector<16x4xf32>
    %103 = arith.maximumf %101, %102 : vector<16x4xf32>
    %c12 = arith.constant 12 : index
    %c0_57 = arith.constant 0 : index
    %104 = vector.load %arg4[%c12, %c0_57] : memref<18x256xf32, #tpu.memory_space<vmem>>, vector<1x8xf32>
    %c168 = arith.constant 168 : index
    %c0_58 = arith.constant 0 : index
    %105 = vector.load %arg3[%c168, %c0_58] : memref<232x64xf32, #tpu.memory_space<vmem>>, vector<4x8xf32>
    %cst_59 = arith.constant dense<0.000000e+00> : vector<16x8xf32>
    %106 = tpu.matmul %103, %105, %cst_59 {dimension_numbers = #tpu.dot_dimension_numbers<[1], [0], [0], [1], [0, 0, 1, 1], [], []>} : vector<16x4xf32>, vector<4x8xf32>, vector<16x8xf32> -> vector<16x8xf32>
    %107 = vector.broadcast %104 : vector<1x8xf32> to vector<16x8xf32>
    %108 = arith.addf %106, %107 : vector<16x8xf32>
    %cst_60 = arith.constant 0.000000e+00 : f32
    %109 = vector.broadcast %cst_60 : f32 to vector<16x8xf32>
    %110 = arith.maximumf %108, %109 : vector<16x8xf32>
    %c13 = arith.constant 13 : index
    %c0_61 = arith.constant 0 : index
    %111 = vector.load %arg4[%c13, %c0_61] : memref<18x256xf32, #tpu.memory_space<vmem>>, vector<1x16xf32>
    %c176 = arith.constant 176 : index
    %c0_62 = arith.constant 0 : index
    %112 = vector.load %arg3[%c176, %c0_62] : memref<232x64xf32, #tpu.memory_space<vmem>>, vector<8x16xf32>
    %cst_63 = arith.constant dense<0.000000e+00> : vector<16x16xf32>
    %113 = tpu.matmul %110, %112, %cst_63 {dimension_numbers = #tpu.dot_dimension_numbers<[1], [0], [0], [1], [0, 0, 1, 1], [], []>} : vector<16x8xf32>, vector<8x16xf32>, vector<16x16xf32> -> vector<16x16xf32>
    %114 = vector.broadcast %111 : vector<1x16xf32> to vector<16x16xf32>
    %115 = arith.addf %113, %114 : vector<16x16xf32>
    %cst_64 = arith.constant 0.000000e+00 : f32
    %116 = vector.broadcast %cst_64 : f32 to vector<16x16xf32>
    %117 = arith.maximumf %115, %116 : vector<16x16xf32>
    %c14 = arith.constant 14 : index
    %c0_65 = arith.constant 0 : index
    %118 = vector.load %arg4[%c14, %c0_65] : memref<18x256xf32, #tpu.memory_space<vmem>>, vector<1x32xf32>
    %c184 = arith.constant 184 : index
    %c0_66 = arith.constant 0 : index
    %119 = vector.load %arg3[%c184, %c0_66] : memref<232x64xf32, #tpu.memory_space<vmem>>, vector<16x32xf32>
    %cst_67 = arith.constant dense<0.000000e+00> : vector<16x32xf32>
    %120 = tpu.matmul %117, %119, %cst_67 {dimension_numbers = #tpu.dot_dimension_numbers<[1], [0], [0], [1], [0, 0, 1, 1], [], []>} : vector<16x16xf32>, vector<16x32xf32>, vector<16x32xf32> -> vector<16x32xf32>
    %121 = vector.broadcast %118 : vector<1x32xf32> to vector<16x32xf32>
    %122 = arith.addf %120, %121 : vector<16x32xf32>
    %cst_68 = arith.constant 0.000000e+00 : f32
    %123 = vector.broadcast %cst_68 : f32 to vector<16x32xf32>
    %124 = arith.maximumf %122, %123 : vector<16x32xf32>
    %c15 = arith.constant 15 : index
    %c0_69 = arith.constant 0 : index
    %125 = vector.load %arg4[%c15, %c0_69] : memref<18x256xf32, #tpu.memory_space<vmem>>, vector<1x64xf32>
    %c200 = arith.constant 200 : index
    %c0_70 = arith.constant 0 : index
    %126 = vector.load %arg3[%c200, %c0_70] : memref<232x64xf32, #tpu.memory_space<vmem>>, vector<32x64xf32>
    %cst_71 = arith.constant dense<0.000000e+00> : vector<16x64xf32>
    %127 = tpu.matmul %124, %126, %cst_71 {dimension_numbers = #tpu.dot_dimension_numbers<[1], [0], [0], [1], [0, 0, 1, 1], [], []>} : vector<16x32xf32>, vector<32x64xf32>, vector<16x64xf32> -> vector<16x64xf32>
    %128 = vector.broadcast %125 : vector<1x64xf32> to vector<16x64xf32>
    %129 = arith.addf %127, %128 : vector<16x64xf32>
    %cst_72 = arith.constant 0.000000e+00 : f32
    %130 = vector.broadcast %cst_72 : f32 to vector<16x64xf32>
    %131 = arith.maximumf %129, %130 : vector<16x64xf32>
    %c16 = arith.constant 16 : index
    %c0_73 = arith.constant 0 : index
    %132 = vector.load %arg4[%c16, %c0_73] : memref<18x256xf32, #tpu.memory_space<vmem>>, vector<1x128xf32>
    %c384 = arith.constant 384 : index
    %c0_74 = arith.constant 0 : index
    %133 = vector.load %arg2[%c384, %c0_74] : memref<576x256xbf16, #tpu.memory_space<vmem>>, vector<64x128xbf16>
    %134 = arith.truncf %131 : vector<16x64xf32> to vector<16x64xbf16>
    %cst_75 = arith.constant dense<0.000000e+00> : vector<16x128xf32>
    %135 = tpu.matmul %134, %133, %cst_75 {dimension_numbers = #tpu.dot_dimension_numbers<[1], [0], [0], [1], [0, 0, 1, 1], [], []>} : vector<16x64xbf16>, vector<64x128xbf16>, vector<16x128xf32> -> vector<16x128xf32>
    %136 = vector.broadcast %132 : vector<1x128xf32> to vector<16x128xf32>
    %137 = arith.addf %135, %136 : vector<16x128xf32>
    %cst_76 = arith.constant 0.000000e+00 : f32
    %138 = vector.broadcast %cst_76 : f32 to vector<16x128xf32>
    %139 = arith.maximumf %137, %138 : vector<16x128xf32>
    %c17 = arith.constant 17 : index
    %c0_77 = arith.constant 0 : index
    %140 = vector.load %arg4[%c17, %c0_77] : memref<18x256xf32, #tpu.memory_space<vmem>>, vector<1x256xf32>
    %c448 = arith.constant 448 : index
    %c0_78 = arith.constant 0 : index
    %141 = vector.load %arg2[%c448, %c0_78] : memref<576x256xbf16, #tpu.memory_space<vmem>>, vector<128x256xbf16>
    %142 = arith.truncf %139 : vector<16x128xf32> to vector<16x128xbf16>
    %cst_79 = arith.constant dense<0.000000e+00> : vector<16x256xf32>
    %143 = tpu.matmul %142, %141, %cst_79 {dimension_numbers = #tpu.dot_dimension_numbers<[1], [0], [0], [1], [0, 0, 1, 1], [], []>} : vector<16x128xbf16>, vector<128x256xbf16>, vector<16x256xf32> -> vector<16x256xf32>
    %144 = vector.broadcast %140 : vector<1x256xf32> to vector<16x256xf32>
    %145 = arith.addf %143, %144 : vector<16x256xf32>
    %146 = arith.negf %145 : vector<16x256xf32>
    %147 = math.exp %146 : vector<16x256xf32>
    %cst_80 = arith.constant 1.000000e+00 : f32
    %148 = vector.broadcast %cst_80 : f32 to vector<16x256xf32>
    %149 = arith.addf %148, %147 : vector<16x256xf32>
    %150 = arith.divf %148, %149 : vector<16x256xf32>
    %c0_81 = arith.constant 0 : index
    %c0_82 = arith.constant 0 : index
    %151 = vector.load %arg6[%c0_81, %c0_82] : memref<16x256xf32, #tpu.memory_space<vmem>>, vector<16x256xf32>
    tpu.vector_store %arg6[%c0_81, %c0_82], %150 {strides = array<i32>} : memref<16x256xf32, #tpu.memory_space<vmem>>, vector<16x256xf32>,
    return
  }
}

</mosaic_0001>

<bundles_post_ra>
// kernel: vae_forward.1
= control target key start
LH: loop header
LB: loop body
LE: loop exit
PB: predicated region body
PF: predicated region fallthrough
CT: control target
= control target key end

     0   :  { %12 = vsyncpa [#allocation3], 0  ;;  %s2344_s21 = smov [#allocation2]   ;;  %s2643_s0 = inlined_call_operand.vmem [shape: f32[16,256], index: 0, kind: input, shape index: {}]   ;;  %s2644_s1 = inlined_call_operand.vmem [shape: f32[16,2], index: 1, kind: input, shape index: {}]   ;;  %s2645_s2 = inlined_call_operand.hbm [shape: bf16[576,256], index: 2, kind: input, shape index: {}]   ;;  %s2646_s3 = inlined_call_operand.vmem [shape: f32[232,64], index: 3, kind: input, shape index: {}]   ;;  %s2647_s4 = inlined_call_operand.vmem [shape: f32[18,256], index: 4, kind: input, shape index: {}]   ;;  %s2648_s5 = inlined_call_operand.vmem [shape: f32[16,4], index: 5, kind: output, shape index: {0}]   ;;  %s2649_s6 = inlined_call_operand.vmem [shape: f32[16,256], index: 6, kind: output, shape index: {1}]  }
   0x1   :  { %s22_s22 = sshll.u32 %s2344_s21, 4  ;;  %s2320_s25 = scalar_lea.hbm %s2645_s2, 9216  ;;  %s23_s22 = int_to_ptr.vmem [resolvable:$true] %s22_s22 }
   0x2   :  { %p2321_p0 = scmp.ne.s32.totalorder %s2645_s2, %s2320_s25  ;;  %p2324_p1 = scmp.lt.u32.totalorder %s2320_s25, %s2645_s2 }
   0x4   :  { %p2326_p2 = pnand %p2324_p1, %p2321_p0 }
   0x6   :  { %2329 = shalt.err (!%p2326_p2)
}
   0x7   :  { %s2330_s30 = scalar_lea.vmem %s23_s22, 9216  ;;  %p2335_p4 = scmp.lt.s32.totalorder %s23_s22, %s23_s22 }
   0x8   :  { %p2331_p3 = scmp.ne.s32.totalorder %s23_s22, %s2330_s30  ;;  %p2336_p5 = scmp.lt.s32.totalorder %s2330_s30, %s2330_s30 }
   0xa   :  { %p2337_p6 = por %p2336_p5, %p2335_p4 }
   0xc   :  { %p2338_p7 = pnand %p2337_p6, %p2331_p3 }
   0xe   :  { %2341 = shalt.err (!%p2338_p7)
}
   0xf   :  { %s2345_s7 = smov 128   ;;  %s2346_s8 = smov 8  }
  0x10   :  { %28 = dma.hbm_to_vmem [thread:$0]  %s2645_s2, 9216, %s23_s22, [#allocation3], %s2345_s7, %s2345_s7, %s2346_s8  }
  0x11   :  { %2342 = dma.done.wait [#allocation3], 9216  }
  0x12   :  { %2343 = vsyncadd [#allocation3], 4294958080  ;;  %v2347_v0 = vmov 0.0   ;;  %v2240_v1 = vld [vmem:[#allocation2 + $0x80] ss:$8 sps:$4 sm:$0xff]   ;;  %v40_v13 = vld [vmem:[%s2643_s0 + $0x18] sm:$0xff] }
  0x13   :  { %2060 = vmatprep.subr.bf16.mxu1 %v2347_v0  ;;  %v2241_v2 = vld [vmem:[#allocation2] ss:$8 sps:$4 sm:$0xff]   ;;  %1967 = vmatprep.subr.bf16.mxu0 %v2240_v1  ;;  %v2242_v3 = vld [vmem:[#allocation2 + $0x90] ss:$8 sps:$4 sm:$0xff]   ;;  %vm2348_vm0 = vmmov 0   ;;  %vm333_vm1 = vcmask 523264  }
  0x14   :  { %1968 = vmatpush3.bf16.msra.mxu0 %v2241_v2  ;;  %v2243_v4 = vld [vmem:[#allocation2 + $0x10] ss:$8 sps:$4 sm:$0xff]   ;;  %v2244_v5 = vld [vmem:[#allocation2 + $0xa0] ss:$8 sps:$4 sm:$0xff]   ;;  %2076 = vmatprep.mubr.msk.bf16.mxu1 %vm2348_vm0, %v2347_v0  ;;  %vm422_vm2 = vcmask 261120   ;;  %vm509_vm3 = vcmask 130048  }
  0x15   :  { %1969 = vmatprep.subr.bf16.mxu0 %v2242_v3  ;;  %v2245_v6 = vld [vmem:[#allocation2 + $0x20] ss:$8 sps:$4 sm:$0xff]   ;;  %v2246_v7 = vld [vmem:[#allocation2 + $0xb0] ss:$8 sps:$4 sm:$0xff]   ;;  %vm595_vm4 = vcmask 64512   ;;  %vm688_vm5 = vcmask 1043456  }
  0x16   :  { %v2247_v8 = vld [vmem:[#allocation2 + $0x30] ss:$8 sps:$4 sm:$0xff]   ;;  %v2248_v9 = vld [vmem:[#allocation2 + $0xc0] ss:$8 sps:$4 sm:$0xff]   ;;  %vm681_vm6 = vcmask 31744   ;;  %vm778_vm7 = vcmask 1041408  }
  0x17   :  { %v2249_v10 = vld [vmem:[#allocation2 + $0x40] ss:$8 sps:$4 sm:$0xff]   ;;  %v2250_v11 = vld [vmem:[#allocation2 + $0xd0] ss:$8 sps:$4 sm:$0xff]   ;;  %vm771_vm8 = vcmask 15360   ;;  %vm868_vm9 = vcmask 1040384  }
  0x18   :  { %1970 = vmatpush3.bf16.msra.mxu0 %v2243_v4  ;;  %v38_v12 = vld [vmem:[%s2643_s0 + $0x8] sm:$0xff]  ;;  %v2251_v14 = vld [vmem:[#allocation2 + $0x50] ss:$8 sps:$4 sm:$0xff]   ;;  %v37_v23 = vld [vmem:[%s2643_s0] sm:$0xff]  ;;  %vm861_vm10 = vcmask 7168   ;;  %s2349_s21 = smov 126  }
  0x19   :  { %1971 = vmatprep.subr.bf16.mxu0 %v2244_v5  ;;  %v75_v15 = vpack.c.bf16 %v40_v13, %v38_v12  ;;  %v2256_v16 = vld [vmem:[#allocation2 + $0x100] ss:$8 sps:$4 sm:$0xff]   ;;  %v2257_v18 = vld [vmem:[#allocation2 + $0x110] ss:$8 sps:$4 sm:$0xff]   ;;  %s2350_s7 = smov 2  }
  0x1a   :  { %v2252_v17 = vld [vmem:[#allocation2 + $0xe0] ss:$8 sps:$4 sm:$0xff]   ;;  %2061 = vmatpush3.bf16.msra.mxu1 %v2256_v16  ;;  %v2254_v20 = vld [vmem:[#allocation2 + $0xf0] ss:$8 sps:$4 sm:$0xff]  }
  0x1b   :  { %204 = vmatprep.mubr.bf16.mxu0 %v75_v15  ;;  %v2253_v19 = vld [vmem:[#allocation2 + $0x60] ss:$8 sps:$4 sm:$0xff]   ;;  %2062 = vmatprep.subr.bf16.mxu1 %v2347_v0  ;;  %v2255_v22 = vld [vmem:[#allocation2 + $0x70] ss:$8 sps:$4 sm:$0xff]  }
  0x1c   :  { %1972 = vmatpush3.bf16.msra.mxu0 %v2245_v6  ;;  %v2258_v21 = vld [vmem:[#allocation2 + $0x120] ss:$8 sps:$4 sm:$0xff]   ;;  %v39_v24 = vld [vmem:[%s2643_s0 + $0x10] sm:$0xff]  ;;  %v328_v35 = vld [vmem:[%s2646_s3 + $0x18] sm:$0xff] }
  0x1d   :  { %1973 = vmatprep.subr.bf16.mxu0 %v2246_v7  ;;  %v2259_v25 = vld [vmem:[#allocation2 + $0x130] ss:$8 sps:$4 sm:$0xff]   ;;  %v74_v26 = vpack.c.bf16 %v39_v24, %v37_v23  ;;  %v2260_v27 = vld [vmem:[#allocation2 + $0x140] ss:$8 sps:$4 sm:$0xff]  }
  0x1e   :  { %2063 = vmatpush3.bf16.msra.mxu1 %v2257_v18  ;;  %v2261_v28 = vld [vmem:[#allocation2 + $0x150] ss:$8 sps:$4 sm:$0xff]   ;;  %v2262_v29 = vld [vmem:[#allocation2 + $0x160] ss:$8 sps:$4 sm:$0xff]  }
  0x1f   :  { %2064 = vmatprep.subr.bf16.mxu1 %v2347_v0  ;;  %v2263_v30 = vld [vmem:[#allocation2 + $0x170] ss:$8 sps:$4 sm:$0xff]   ;;  %v325_v31 = vld [vmem:[%s2646_s3] sm:$0xff]  ;;  %v326_v32 = vld [vmem:[%s2646_s3 + $0x8] sm:$0xff] }
  0x20   :  { %1974 = vmatpush3.bf16.msra.mxu0 %v2247_v8  ;;  %v327_v33 = vld [vmem:[%s2646_s3 + $0x10] sm:$0xff]  ;;  %v2192_v34 = vpack.c.bf16 %v326_v32, %v325_v31  ;;  %v329_v37 = vld [vmem:[%s2646_s3 + $0x20] sm:$0xff]  ;;  %v330_v38 = vld [vmem:[%s2646_s3 + $0x28] sm:$0xff] }
  0x21   :  { %1975 = vmatprep.subr.bf16.mxu0 %v2248_v9  ;;  %v2196_v36 = vpack.c.bf16 %v328_v35, %v327_v33  ;;  %v2200_v39 = vpack.c.bf16 %v330_v38, %v329_v37  ;;  %v41_v41 = vld [vmem:[%s2647_s4] ss:$0 sm:$0xff]  ;;  %v331_v52 = vld [vmem:[%s2646_s3 + $0x30] sm:$0xff]  ;;  %v332_v53 = vld [vmem:[%s2646_s3 + $0x38] sm:$0xff] }
  0x22   :  { %2065 = vmatpush3.bf16.msra.mxu1 %v2258_v21  ;;  %v2204_v54 = vpack.c.bf16 %v332_v53, %v331_v52  ;;  %v418_v55 = vld [vmem:[%s2646_s3 + $0x40] sm:$0xff]  ;;  %v419_v56 = vld [vmem:[%s2646_s3 + $0x48] sm:$0xff]  ;;  %v420_v4 = vld [vmem:[%s2646_s3 + $0x50] sm:$0xff] }
  0x23   :  { %2066 = vmatprep.subr.bf16.mxu1 %v2347_v0  ;;  %v2208_v57 = vpack.c.bf16 %v419_v56, %v418_v55  ;;  %v215_v58 = vld [vmem:[%s2647_s4 + $0x1] ss:$0 sm:$0xff]  ;;  %v421_v5 = vld [vmem:[%s2646_s3 + $0x58] sm:$0xff]  ;;  %v324_v7 = vld [vmem:[%s2647_s4 + $0x2] ss:$0 sm:$0xff] }
  0x24   :  { %1976 = vmatpush3.bf16.msra.mxu0 %v2249_v10  ;;  %v2212_v6 = vpack.c.bf16 %v421_v5, %v420_v4  ;;  %v508_v15 = vld [vmem:[%s2646_s3 + $0x68] sm:$0xff]  ;;  %v594_v24 = vld [vmem:[%s2646_s3 + $0x70] sm:$0xff]  ;;  %v680_v32 = vld [vmem:[%s2646_s3 + $0x78] sm:$0xf] }
  0x25   :  { %1977 = vmatprep.subr.bf16.mxu0 %v2250_v11  ;;  %v593_v33 = vld [vmem:[%s2647_s4 + $0x5] ss:$0 sm:$0xff]  ;;  %v859_v56 = vld [vmem:[%s2647_s4 + $0x10] ss:$0 sm:$0xff] }
  0x26   :  { %2067 = vmatpush3.bf16.msra.mxu1 %v2259_v25  ;;  %v506_v25 = vld [vmem:[%s2647_s4 + $0x4] ss:$0 sm:$0xff] }
  0x27   :  { %2068 = vmatprep.subr.bf16.mxu1 %v2347_v0  ;;  %v953_v5 = vld [vmem:[%s2644_s1] sm:$0xff] }
  0x28   :  { %1978 = vmatpush3.bf16.msra.mxu0 %v2251_v14  ;;  %v507_v14 = vld [vmem:[%s2646_s3 + $0x60] sm:$0xff] }
  0x29   :  { %1979 = vmatprep.subr.bf16.mxu0 %v2252_v17  ;;  %v2216_v16 = vpack.c.bf16 %v508_v15, %v507_v14  ;;  %v417_v17 = vld [vmem:[%s2647_s4 + $0x3] ss:$0 sm:$0xff]  ;;  %v1090_v15 = vld [vmem:[%s2646_s3 + $0x98] sm:$0x1] }
  0x2a   :  { %2069 = vmatpush3.bf16.msra.mxu1 %v2260_v27 }
  0x2b   :  { %2070 = vmatprep.subr.bf16.mxu1 %v2347_v0 }
  0x2c   :  { %1980 = vmatpush3.bf16.msra.mxu0 %v2253_v19 }
  0x2d   :  { %1981 = vmatprep.subr.bf16.mxu0 %v2254_v20 }
  0x2e   :  { %2071 = vmatpush3.bf16.msra.mxu1 %v2261_v28 }
  0x2f   :  { %2072 = vmatprep.subr.bf16.mxu1 %v2347_v0 }
  0x30   :  { %1982 = vmatpush3.bf16.msra.mxu0 %v2255_v22 }
  0x31   :  { %2193 = vmatprep.subr.bf16.mxu0 %v2192_v34 }
  0x32   :  { %2073 = vmatpush3.bf16.msra.mxu1 %v2262_v29 }
  0x33   :  { %205 = vmatmul.mubr.bf16.vlgmr.msra.gmra.mrb[0].mxu0 %v74_v26  ;;  %2074 = vmatprep.subr.bf16.mxu1 %v2347_v0 }
  0x34   :  { %2195 = vmatpush3.bf16.msra.mxu0 %v2192_v34 }
  0x35   :  { %2197 = vmatprep.subr.bf16.mxu0 %v2196_v36 }
  0x36   :  { %2075 = vmatpush3.bf16.msra.mxu1 %v2263_v30 }
  0x37   :  { %2209 = vmatprep.subr.bf16.mxu1 %v2208_v57 }
  0x38   :  { %2199 = vmatpush3.bf16.msra.mxu0 %v2196_v36 }
  0x39   :  { %2201 = vmatprep.subr.bf16.mxu0 %v2200_v39 }
  0x3c   :  { %2203 = vmatpush3.bf16.msra.mxu0 %v2200_v39 }
  0x3d   :  { %2205 = vmatprep.subr.bf16.mxu0 %v2204_v54 }
  0x40   :  { %2207 = vmatpush3.bf16.msra.mxu0 %v2204_v54 }
  0x41   :  { %2122 = vmatprep.subr.msk.mxu0 %vm688_vm5, %v680_v32 }
 0x106   :  { %v1983_v40 = vpop.f32.mrb[0].mxu0 }
 0x107   :  { %v1984_v42 = vpop.f32.mrb[1].mxu0 }
 0x108   :  { %v1985_v43 = vadd.f32 %v1984_v42, %v1983_v40  ;;  %v1986_v44 = vpop.f32.mrb[2].mxu0  ;;  %v770_v40 = vld [vmem:[%s2646_s3 + $0x80] sm:$0x3] }
 0x109   :  { %v1987_v45 = vpop.f32.mrb[3].mxu0 }
 0x10a   :  { %v207_v46 = vadd.f32 %v1985_v43, %v41_v41  ;;  %v1988_v47 = vadd.f32 %v1987_v45, %v1986_v44 }
 0x10c   :  { %v210_v48 = vadd.f32 %v1988_v47, %v41_v41  ;;  %v213_v49 = vmax.f32 %v207_v46, 0.0  ;;  %v679_v41 = vld [vmem:[%s2647_s4 + $0x6] ss:$0 sm:$0xff] }
 0x10e   :  { %v214_v50 = vmax.f32 %v210_v48, 0.0  ;;  %v860_v48 = vld [vmem:[%s2646_s3 + $0x88] sm:$0x1] }
 0x110   :  { %v232_v51 = vpack.c.bf16 %v214_v50, %v213_v49  ;;  %v769_v49 = vld [vmem:[%s2647_s4 + $0x7] ss:$0 sm:$0xff] }
 0x112   :  { %2077 = vmatmul.mubr.bf16.vlgmr.msra.gmra.mrb[0].mxu1 %v232_v51 }
 0x113   :  { %2211 = vmatpush3.bf16.msra.mxu1 %v2208_v57 }
 0x114   :  { %2213 = vmatprep.subr.bf16.mxu1 %v2212_v6 }
 0x117   :  { %2215 = vmatpush3.bf16.msra.mxu1 %v2212_v6 }
 0x118   :  { %2217 = vmatprep.subr.bf16.mxu1 %v2216_v16 }
 0x1e5   :  { %v315_v59 = vpop.f32.mrb[0].mxu1 }
 0x1e6   :  { %v316_v60 = vadd.f32 %v315_v59, %v215_v58  ;;  %v2078_v61 = vpop.f32.mrb[1].mxu1 }
 0x1e7   :  { %v318_v62 = vpop.f32.mrb[2].mxu1 }
 0x1e8   :  { %v322_v63 = vmax.f32 %v316_v60, 0.0  ;;  %v319_v1 = vadd.f32 %v318_v62, %v215_v58  ;;  %v2079_v2 = vpop.f32.mrb[3].mxu1 }
 0x1e9   :  { %v1002_v2 = vld [vmem:[%s2646_s3 + $0x90] sm:$0x3] }
 0x1ea   :  { %v323_v3 = vmax.f32 %v319_v1, 0.0  ;;  %2096 = vmatprep.mubr.msk.f32.mxu0 %vm333_vm1, %v322_v63 }
 0x1ec   :  { %2097 = vmatmul.mubr.msk.f32.vlgmr.msra.gmra.mrb[4].mxu0 %vm333_vm1, %v323_v3 }
 0x1ed   :  { %2123 = vmatpush3.msk.msra.mxu0 %vm688_vm5, %v680_v32 }
 0x1ee   :  { %2132 = vmatprep.subr.msk.mxu0 %vm868_vm9, %v860_v48 }
 0x2bf   :  { %v2098_v8 = vpop.f32.mrb[4].mxu0 }
 0x2c0   :  { %v412_v9 = vadd.f32 %v2098_v8, %v324_v7  ;;  %v406_v10 = vpop.f32.mrb[5].mxu0  ;;  %v954_v8 = vld [vmem:[%s2644_s1 + $0x8] sm:$0xff] }
 0x2c1   :  { %v407_v11 = vadd.f32 %v406_v10, %v324_v7 }
 0x2c2   :  { %v416_v13 = vmax.f32 %v412_v9, 0.0 }
 0x2c3   :  { %v415_v12 = vmax.f32 %v407_v11, 0.0 }
 0x2c5   :  { %2107 = vmatprep.mubr.msk.f32.mxu1 %vm422_vm2, %v415_v12 }
 0x2c6   :  { %2108 = vmatmul.mubr.msk.f32.vlgmr.msra.gmra.mrb[4].mxu1 %vm422_vm2, %v416_v13 }
 0x2c7   :  { %2219 = vmatpush3.bf16.msra.mxu1 %v2216_v16 }
 0x2c8   :  { %2117 = vmatprep.subr.mxu1 %v594_v24 }
 0x399   :  { %v2109_v18 = vpop.f32.mrb[4].mxu1 }
 0x39a   :  { %v501_v19 = vadd.f32 %v2109_v18, %v417_v17  ;;  %v495_v20 = vpop.f32.mrb[5].mxu1 }
 0x39b   :  { %v496_v21 = vadd.f32 %v495_v20, %v417_v17 }
 0x39c   :  { %v505_v23 = vmax.f32 %v501_v19, 0.0 }
 0x39d   :  { %v504_v22 = vmax.f32 %v496_v21, 0.0 }
 0x39f   :  { %2114 = vmatprep.mubr.msk.f32.mxu1 %vm509_vm3, %v504_v22 }
 0x3a0   :  { %2115 = vmatmul.mubr.msk.f32.vlgmr.msra.gmra.mrb[6].mxu1 %vm509_vm3, %v505_v23 }
 0x3a1   :  { %2118 = vmatpush3.msra.mxu1 %v594_v24 }
 0x3a2   :  { %2127 = vmatprep.subr.msk.mxu1 %vm778_vm7, %v770_v40 }
 0x473   :  { %v2116_v26 = vpop.f32.mrb[6].mxu1 }
 0x474   :  { %v588_v27 = vadd.f32 %v2116_v26, %v506_v25  ;;  %v582_v28 = vpop.f32.mrb[7].mxu1  ;;  %v1001_v26 = vld [vmem:[%s2647_s4 + $0x11] ss:$0 sm:$0xff] }
 0x475   :  { %v583_v29 = vadd.f32 %v582_v28, %v506_v25 }
 0x476   :  { %v592_v31 = vmax.f32 %v588_v27, 0.0 }
 0x477   :  { %v591_v30 = vmax.f32 %v583_v29, 0.0 }
 0x479   :  { %2119 = vmatprep.mubr.msk.f32.mxu1 %vm595_vm4, %v591_v30 }
 0x47a   :  { %2120 = vmatmul.mubr.msk.f32.vlgmr.msra.gmra.mrb[8].mxu1 %vm595_vm4, %v592_v31 }
 0x47b   :  { %2128 = vmatpush3.msk.msra.mxu1 %vm778_vm7, %v770_v40 }
 0x47c   :  { %2137 = vmatprep.subr.msk.mxu1 %vm778_vm7, %v1002_v2 }
 0x54d   :  { %v2121_v34 = vpop.f32.mrb[8].mxu1 }
 0x54e   :  { %v674_v35 = vadd.f32 %v2121_v34, %v593_v33  ;;  %v668_v36 = vpop.f32.mrb[9].mxu1 }
 0x54f   :  { %v669_v37 = vadd.f32 %v668_v36, %v593_v33 }
 0x550   :  { %v678_v39 = vmax.f32 %v674_v35, 0.0  ;;  %v1178_v35 = vld [vmem:[%s2646_s3 + $0xa0] sm:$0x3] }
 0x551   :  { %v677_v38 = vmax.f32 %v669_v37, 0.0 }
 0x553   :  { %2124 = vmatprep.mubr.msk.f32.mxu0 %vm681_vm6, %v677_v38 }
 0x554   :  { %2125 = vmatmul.mubr.msk.f32.vlgmr.msra.gmra.mrb[6].mxu0 %vm681_vm6, %v678_v39 }
 0x555   :  { %2133 = vmatpush3.msk.msra.mxu0 %vm868_vm9, %v860_v48 }
 0x556   :  { %2142 = vmatprep.subr.msk.mxu0 %vm868_vm9, %v1090_v15 }
 0x627   :  { %v2126_v42 = vpop.f32.mrb[6].mxu0 }
 0x628   :  { %v764_v43 = vadd.f32 %v2126_v42, %v679_v41  ;;  %v758_v44 = vpop.f32.mrb[7].mxu0  ;;  %v1089_v42 = vld [vmem:[%s2647_s4 + $0x12] ss:$0 sm:$0xff] }
 0x629   :  { %v759_v45 = vadd.f32 %v758_v44, %v679_v41 }
 0x62a   :  { %v768_v47 = vmax.f32 %v764_v43, 0.0 }
 0x62b   :  { %v767_v46 = vmax.f32 %v759_v45, 0.0 }
 0x62d   :  { %2129 = vmatprep.mubr.msk.f32.mxu1 %vm771_vm8, %v767_v46 }
 0x62e   :  { %2130 = vmatmul.mubr.msk.f32.vlgmr.msra.gmra.mrb[10].mxu1 %vm771_vm8, %v768_v47 }
 0x62f   :  { %2138 = vmatpush3.msk.msra.mxu1 %vm778_vm7, %v1002_v2 }
 0x630   :  { %2147 = vmatprep.subr.msk.mxu1 %vm778_vm7, %v1178_v35 }
 0x701   :  { %v2131_v50 = vpop.f32.mrb[10].mxu1 }
 0x702   :  { %v854_v51 = vadd.f32 %v2131_v50, %v769_v49  ;;  %v848_v52 = vpop.f32.mrb[11].mxu1 }
 0x703   :  { %v849_v53 = vadd.f32 %v848_v52, %v769_v49  ;;  %v1177_v52 = vld [vmem:[%s2647_s4 + $0x13] ss:$0 sm:$0xff] }
 0x704   :  { %v858_v55 = vmax.f32 %v854_v51, 0.0  ;;  %v1266_v51 = vld [vmem:[%s2646_s3 + $0xa8] sm:$0xf] }
 0x705   :  { %v857_v54 = vmax.f32 %v849_v53, 0.0 }
 0x707   :  { %2134 = vmatprep.mubr.msk.f32.mxu0 %vm861_vm10, %v857_v54 }
 0x708   :  { %2135 = vmatmul.mubr.msk.f32.vlgmr.msra.gmra.mrb[8].mxu0 %vm861_vm10, %v858_v55 }
 0x709   :  { %2143 = vmatpush3.msk.msra.mxu0 %vm868_vm9, %v1090_v15 }
 0x70a   :  { %2152 = vmatprep.subr.msk.mxu0 %vm688_vm5, %v1266_v51 }
 0x7db   :  { %v2136_v57 = vpop.f32.mrb[8].mxu0 }
 0x7dc   :  { %v944_v58 = vadd.f32 %v2136_v57, %v859_v56  ;;  %v938_v59 = vpop.f32.mrb[9].mxu0 }
 0x7dd   :  { %v939_v60 = vadd.f32 %v938_v59, %v859_v56  ;;  %v1354_v59 = vld [vmem:[%s2646_s3 + $0xb0] sm:$0xff] }
 0x7de   :  { %v948_v61 = vmul.f32 0.5, %v944_v58 }
 0x7df   :  { %v947_v62 = vmul.f32 0.5, %v939_v60 }
 0x7e0   :  { %v951_v1 = vmul.f32 1.442695, %v948_v61 }
 0x7e1   :  { %v949_v63 = vmul.f32 1.442695, %v947_v62 }
 0x7e3   :  { %2292 = vpow2.f32 %v949_v63 }
 0x7e4   :  { %2294 = vpow2.f32 %v951_v1 }
 0x7ed   :  { %v2293_v3 = vpop.eup %2292 }
 0x7ee   :  { %957 = vrot.lane.b32.xlu0 %v2293_v3, %s2349_s21  ;;  %v2295_v4 = vpop.eup %2294 }
 0x7f2   :  { %959 = vrot.lane.b32.xlu0 %v2295_v4, %s2349_s21  ;;  %v1439_v4 = vld [vmem:[%s2646_s3 + $0xb8] sm:$0xff] }
 0x860   :  { %v958_v6 = vpop.permute.xlu0 %957 }
 0x861   :  { %v963_v7 = vmul.f32 %v958_v6, %v953_v5  ;;  %v1440_v5 = vld [vmem:[%s2646_s3 + $0xc0] sm:$0xff] }
 0x862   :  { %v2220_v6 = vpack.c.bf16 %v1440_v5, %v1439_v4  ;;  %v1946_v5 = vld [vmem:[%s2647_s4 + $0x21] ss:$8 sm:$0x3] }
 0x863   :  { %v965_v9 = vadd.f32 %v963_v7, %v939_v60  ;;  %v1265_v60 = vld [vmem:[%s2647_s4 + $0x14] ss:$0 sm:$0xff]  ;;  %v1525_v7 = vld [vmem:[%s2646_s3 + $0xc8] sm:$0xff] }
 0x864   :  { %v960_v10 = vpop.permute.xlu0 %959 }
 0x865   :  { %v964_v11 = vmul.f32 %v960_v10, %v954_v8  ;;  %2139 = vmatprep.mubr.msk.f32.mxu1 %vm771_vm8, %v965_v9  ;;  %v967_v12 = vsel %vm771_vm8, %v965_v9, -inf  ;;  %v1526_v8 = vld [vmem:[%s2646_s3 + $0xd0] sm:$0xff] }
 0x866   :  { %968 = vmax.xlane.f32.xlu1 %v967_v12  ;;  %v1353_v10 = vld [vmem:[%s2647_s4 + $0x15] ss:$0 sm:$0xff] }
 0x867   :  { %v966_v13 = vadd.f32 %v964_v11, %v944_v58 }
 0x869   :  { %2140 = vmatmul.mubr.msk.f32.vlgmr.msra.gmra.mrb[12].mxu1 %vm771_vm8, %v966_v13  ;;  %v970_v14 = vsel %vm771_vm8, %v966_v13, -inf }
 0x86a   :  { %971 = vmax.xlane.f32.xlu1 %v970_v14  ;;  %2148 = vmatpush3.msk.msra.mxu1 %vm778_vm7, %v1178_v35  ;;  %v2276_v35 = vld [vmem:[#allocation2 + $0x1e4] ss:$8 sps:$4 sm:$0xff]  }
 0x86b   :  { %2157 = vmatprep.subr.mxu1 %v1354_v59 }
 0x8f3   :  { %v969_v16 = vpop.xlane.xlu1 %968 }
 0x8f4   :  { %v973_v17 = vsub.f32 %v965_v9, %v969_v16 }
 0x8f6   :  { %v975_v18 = vmul.f32 1.442695, %v973_v17  ;;  %v1527_v17 = vld [vmem:[%s2646_s3 + $0xd8] sm:$0xff] }
 0x8f7   :  { %v972_v19 = vpop.xlane.xlu1 %971 }
 0x8f8   :  { %2296 = vpow2.f32 %v975_v18  ;;  %v974_v20 = vsub.f32 %v966_v13, %v972_v19  ;;  %v1528_v18 = vld [vmem:[%s2646_s3 + $0xe0] sm:$0xff] }
 0x8f9   :  { %v2228_v19 = vpack.c.bf16 %v1528_v18, %v1527_v17 }
 0x8fa   :  { %v977_v21 = vmul.f32 1.442695, %v974_v20  ;;  %v1438_v20 = vld [vmem:[%s2647_s4 + $0x16] ss:$0 sm:$0xff] }
 0x8fc   :  { %2298 = vpow2.f32 %v977_v21 }
 0x902   :  { %v2297_v22 = vpop.eup %2296 }
 0x903   :  { %v979_v23 = vsel %vm771_vm8, %v2297_v22, 0.0 }
 0x904   :  { %980 = vadd.xlane.f32.xlu0 %v979_v23 }
 0x906   :  { %v2299_v24 = vpop.eup %2298 }
 0x907   :  { %v982_v25 = vsel %vm771_vm8, %v2299_v24, 0.0 }
 0x908   :  { %983 = vadd.xlane.f32.xlu1 %v982_v25 }
 0x93c   :  { %v2141_v27 = vpop.f32.mrb[12].mxu1 }
 0x93d   :  { %v1084_v28 = vadd.f32 %v2141_v27, %v1001_v26  ;;  %v1078_v29 = vpop.f32.mrb[13].mxu1 }
 0x93e   :  { %v1079_v30 = vadd.f32 %v1078_v29, %v1001_v26  ;;  %v2264_v26 = vld [vmem:[#allocation2 + $0x180] ss:$8 sps:$4 sm:$0xff]  }
 0x93f   :  { %v1088_v32 = vmax.f32 %v1084_v28, 0.0  ;;  %v2265_v28 = vld [vmem:[#allocation2 + $0x190] ss:$8 sps:$4 sm:$0xff]   ;;  %v2266_v29 = vld [vmem:[#allocation2 + $0x1a0] ss:$8 sps:$4 sm:$0xff]  }
 0x940   :  { %v1087_v31 = vmax.f32 %v1079_v30, 0.0  ;;  %v2267_v30 = vld [vmem:[#allocation2 + $0x1b0] ss:$8 sps:$4 sm:$0xff]  }
 0x942   :  { %2144 = vmatprep.mubr.msk.f32.mxu0 %vm861_vm10, %v1087_v31  ;;  %v2268_v31 = vld [vmem:[#allocation2 + $0x1c0] ss:$8 sps:$4 sm:$0xff]  }
 0x943   :  { %2145 = vmatmul.mubr.msk.f32.vlgmr.msra.gmra.mrb[10].mxu0 %vm861_vm10, %v1088_v32  ;;  %v2270_v32 = vld [vmem:[#allocation2 + $0x1c4] ss:$8 sps:$4 sm:$0xff]  }
 0x944   :  { %2153 = vmatpush3.msk.msra.mxu0 %vm688_vm5, %v1266_v51  ;;  %v2286_v51 = vld [vmem:[#allocation2 + $0x220] ss:$8 sps:$4 sm:$0xff]  }
 0x945   :  { %2221 = vmatprep.subr.bf16.mxu0 %v2220_v6 }
 0x991   :  { %v981_v33 = vpop.xlane.xlu0 %980 }
 0x992   :  { %2300 = vrcp.f32 %v981_v33  ;;  %v2273_v33 = vld [vmem:[#allocation2 + $0x1d4] ss:$8 sps:$4 sm:$0xff]  }
 0x995   :  { %v984_v34 = vpop.xlane.xlu1 %983 }
 0x996   :  { %2302 = vrcp.f32 %v984_v34  ;;  %v2271_v34 = vld [vmem:[#allocation2 + $0x1d0] ss:$8 sps:$4 sm:$0xff]  }
 0x99c   :  { %v2301_v36 = vpop.eup %2300 }
 0x99d   :  { %v986_v37 = vmul.f32 %v2301_v36, %v2297_v22  ;;  %v2274_v36 = vld [vmem:[#allocation2 + $0x1e0] ss:$8 sps:$4 sm:$0xff]  }
 0x99f   :  { %991 = vrot.lane.b32.xlu1 %v986_v37, %s2350_s7  ;;  %v2279_v37 = vld [vmem:[#allocation2 + $0x1f4] ss:$8 sps:$4 sm:$0xff]  }
 0x9a0   :  { %v2303_v38 = vpop.eup %2302 }
 0x9a1   :  { %v988_v39 = vmul.f32 %v2303_v38, %v2299_v24  ;;  %v2277_v38 = vld [vmem:[#allocation2 + $0x1f0] ss:$8 sps:$4 sm:$0xff]  }
 0x9a3   :  { %993 = vrot.lane.b32.xlu1 %v988_v39, %s2350_s7  ;;  %v2282_v39 = vld [vmem:[#allocation2 + $0x204] ss:$8 sps:$4 sm:$0xff]  }
 0xa11   :  { %v992_v40 = vpop.permute.xlu1 %991 }
 0xa12   :  { %v997_v41 = vsel %vm771_vm8, %v965_v9, %v992_v40  ;;  %v2224_v9 = vpack.c.bf16 %v1526_v8, %v1525_v7  ;;  %v2285_v40 = vld [vmem:[#allocation2 + $0x214] ss:$8 sps:$4 sm:$0xff]  }
 0xa13   :  { %999 = vst.msk [vmem:[%s2648_s5] sm:$0xff] %vm681_vm6, %v997_v41  ;;  %v2283_v41 = vld [vmem:[#allocation2 + $0x210] ss:$8 sps:$4 sm:$0xff]  }
 0xa15   :  { %v994_v43 = vpop.permute.xlu1 %993 }
 0xa16   :  { %v998_v44 = vsel %vm771_vm8, %v966_v13, %v994_v43  ;;  %v2146_v45 = vpop.f32.mrb[10].mxu0 }
 0xa17   :  { %1000 = vst.msk [vmem:[%s2648_s5 + $0x8] sm:$0xff] %vm681_vm6, %v998_v44  ;;  %v1172_v46 = vadd.f32 %v2146_v45, %v1089_v42  ;;  %v1166_v47 = vpop.f32.mrb[11].mxu0 }
 0xa18   :  { %v1167_v48 = vadd.f32 %v1166_v47, %v1089_v42  ;;  %v1524_v42 = vld [vmem:[%s2647_s4 + $0x17] ss:$0 sm:$0xff] }
 0xa19   :  { %v1176_v50 = vmax.f32 %v1172_v46, 0.0 }
 0xa1a   :  { %v1175_v49 = vmax.f32 %v1167_v48, 0.0 }
 0xa1c   :  { %2149 = vmatprep.mubr.msk.f32.mxu1 %vm771_vm8, %v1175_v49 }
 0xa1d   :  { %2150 = vmatmul.mubr.msk.f32.vlgmr.msra.gmra.mrb[14].mxu1 %vm771_vm8, %v1176_v50  ;;  %v2288_v50 = vld [vmem:[#allocation2 + $0x224] ss:$8 sps:$4 sm:$0xff]  }
 0xa1e   :  { %2158 = vmatpush3.msra.mxu1 %v1354_v59 }
 0xa1f   :  { %1802 = vmatprep.subr.bf16.mxu1 %v2270_v32 }
 0xaf0   :  { %v2151_v53 = vpop.f32.mrb[14].mxu1 }
 0xaf1   :  { %v1260_v54 = vadd.f32 %v2151_v53, %v1177_v52  ;;  %v1254_v55 = vpop.f32.mrb[15].mxu1  ;;  %v2289_v53 = vld [vmem:[#allocation2 + $0x230] ss:$8 sps:$4 sm:$0xff]  }
 0xaf2   :  { %v1255_v56 = vadd.f32 %v1254_v55, %v1177_v52  ;;  %v2291_v52 = vld [vmem:[#allocation2 + $0x234] ss:$8 sps:$4 sm:$0xff]   ;;  %v1612_v55 = vld [vmem:[%s2647_s4 + $0x20] ss:$0 sm:$0xff] }
 0xaf3   :  { %v1264_v58 = vmax.f32 %v1260_v54, 0.0  ;;  %v2351_v54 = vmov 0  }
 0xaf4   :  { %v1263_v57 = vmax.f32 %v1255_v56, 0.0 }
 0xaf6   :  { %2154 = vmatprep.mubr.msk.f32.mxu0 %vm681_vm6, %v1263_v57 }
 0xaf7   :  { %2155 = vmatmul.mubr.msk.f32.vlgmr.msra.gmra.mrb[12].mxu0 %vm681_vm6, %v1264_v58 }
 0xaf8   :  { %2223 = vmatpush3.bf16.msra.mxu0 %v2220_v6 }
 0xaf9   :  { %2225 = vmatprep.subr.bf16.mxu0 %v2224_v9 }
 0xbca   :  { %v2156_v61 = vpop.f32.mrb[12].mxu0 }
 0xbcb   :  { %v1348_v62 = vadd.f32 %v2156_v61, %v1265_v60  ;;  %v1342_v63 = vpop.f32.mrb[13].mxu0 }
 0xbcc   :  { %v1343_v1 = vadd.f32 %v1342_v63, %v1265_v60 }
 0xbcd   :  { %v1352_v3 = vmax.f32 %v1348_v62, 0.0 }
 0xbce   :  { %v1351_v2 = vmax.f32 %v1343_v1, 0.0 }
 0xbd0   :  { %2159 = vmatprep.mubr.msk.f32.mxu1 %vm595_vm4, %v1351_v2  ;;  %v1712_v2 = vlaneseq }
 0xbd1   :  { %2160 = vmatmul.mubr.msk.f32.vlgmr.msra.gmra.mrb[16].mxu1 %vm595_vm4, %v1352_v3 }
 0xbd2   :  { %1803 = vmatpush1.bf16.msra.mxu1 %v2268_v31  ;;  %1834 = vmatprep.mubr.bf16.mxu1 %v2351_v54  ;;  %v1713_v3 = vshrl.u32 %v1712_v2, 7 }
 0xbd3   :  { %1804 = vmatprep.subr.bf16.mxu1 %v2273_v33 }
 0xbd4   :  { %v1714_v4 = vsub.s32 0, %v1713_v3  ;;  %v1718_v6 = vsub.s32 1, %v1713_v3 }
 0xbd6   :  { %1805 = vmatpush1.bf16.msra.mxu1 %v2271_v34  ;;  %v1715_v7 = vrot.slane %v1946_v5, %v1714_v4  ;;  %v1719_v8 = vrot.slane %v1946_v5, %v1718_v6 }
 0xbd7   :  { %1806 = vmatprep.subr.bf16.mxu1 %v2276_v35 }
 0xbda   :  { %1807 = vmatpush1.bf16.msra.mxu1 %v2274_v36 }
 0xbdb   :  { %1808 = vmatprep.subr.bf16.mxu1 %v2279_v37 }
 0xbde   :  { %1809 = vmatpush1.bf16.msra.mxu1 %v2277_v38 }
 0xbdf   :  { %1810 = vmatprep.subr.bf16.mxu1 %v2282_v39 }
 0xca4   :  { %v2161_v11 = vpop.f32.mrb[16].mxu1 }
 0xca5   :  { %v1433_v12 = vadd.f32 %v2161_v11, %v1353_v10  ;;  %v1427_v13 = vpop.f32.mrb[17].mxu1 }
 0xca6   :  { %v1428_v14 = vadd.f32 %v1427_v13, %v1353_v10 }
 0xca7   :  { %v1437_v16 = vmax.f32 %v1433_v12, 0.0 }
 0xca8   :  { %v1436_v15 = vmax.f32 %v1428_v14, 0.0 }
 0xcaa   :  { %2166 = vmatprep.mubr.msk.f32.mxu0 %vm509_vm3, %v1436_v15 }
 0xcab   :  { %2167 = vmatmul.mubr.msk.f32.vlgmr.msra.gmra.mrb[14].mxu0 %vm509_vm3, %v1437_v16 }
 0xcac   :  { %2227 = vmatpush3.bf16.msra.mxu0 %v2224_v9 }
 0xcad   :  { %2229 = vmatprep.subr.bf16.mxu0 %v2228_v19 }
 0xcb0   :  { %2231 = vmatpush3.bf16.msra.mxu0 %v2228_v19 }
 0xcb1   :  { %2180 = vmatprep.subr.bf16.mxu0 %v2347_v0 }
 0xd7e   :  { %v2168_v21 = vpop.f32.mrb[14].mxu0 }
 0xd7f   :  { %v1519_v22 = vadd.f32 %v2168_v21, %v1438_v20  ;;  %v1513_v23 = vpop.f32.mrb[15].mxu0 }
 0xd80   :  { %v1514_v24 = vadd.f32 %v1513_v23, %v1438_v20 }
 0xd81   :  { %v1523_v27 = vmax.f32 %v1519_v22, 0.0 }
 0xd82   :  { %v1522_v25 = vmax.f32 %v1514_v24, 0.0 }
 0xd84   :  { %2177 = vmatprep.mubr.msk.f32.mxu0 %vm422_vm2, %v1522_v25 }
 0xd85   :  { %2178 = vmatmul.mubr.msk.f32.vlgmr.msra.gmra.mrb[16].mxu0 %vm422_vm2, %v1523_v27 }
 0xd86   :  { %2181 = vmatpush3.bf16.msra.mxu0 %v2264_v26  ;;  %2188 = vmatprep.mubr.msk.bf16.mxu0 %vm2348_vm0, %v2347_v0 }
 0xd87   :  { %2182 = vmatprep.subr.bf16.mxu0 %v2347_v0 }
 0xd8a   :  { %2183 = vmatpush3.bf16.msra.mxu0 %v2265_v28 }
 0xd8b   :  { %2184 = vmatprep.subr.bf16.mxu0 %v2347_v0 }
 0xd8e   :  { %2185 = vmatpush3.bf16.msra.mxu0 %v2266_v29 }
 0xd8f   :  { %2186 = vmatprep.subr.bf16.mxu0 %v2347_v0  ;;  %v2280_v0 = vld [vmem:[#allocation2 + $0x200] ss:$8 sps:$4 sm:$0xff]  }
 0xd90   :  { %1811 = vmatpush1.bf16.msra.mxu1 %v2280_v0 }
 0xd91   :  { %1812 = vmatprep.subr.bf16.mxu1 %v2285_v40 }
 0xd92   :  { %2187 = vmatpush3.bf16.msra.mxu0 %v2267_v30 }
 0xd94   :  { %1813 = vmatpush1.bf16.msra.mxu1 %v2283_v41 }
 0xd95   :  { %1814 = vmatprep.subr.bf16.mxu1 %v2288_v50 }
 0xd98   :  { %1815 = vmatpush1.bf16.msra.mxu1 %v2286_v51 }
 0xd99   :  { %1816 = vmatprep.subr.bf16.mxu1 %v2291_v52 }
 0xd9c   :  { %1817 = vmatpush1.bf16.msra.mxu1 %v2289_v53 }
 0xe58   :  { %v2179_v43 = vpop.f32.mrb[16].mxu0 }
 0xe59   :  { %v1607_v44 = vadd.f32 %v2179_v43, %v1524_v42  ;;  %v1601_v45 = vpop.f32.mrb[17].mxu0 }
 0xe5a   :  { %v1602_v46 = vadd.f32 %v1601_v45, %v1524_v42 }
 0xe5b   :  { %v1611_v47 = vmax.f32 %v1607_v44, 0.0 }
 0xe5c   :  { %v1610_v48 = vmax.f32 %v1602_v46, 0.0 }
 0xe5e   :  { %v1621_v49 = vpack.c.bf16 %v1611_v47, %v1610_v48 }
 0xe60   :  { %2189 = vmatmul.mubr.msk.bf16.vlgmr.msra.gmra.mrb[20].mxu0 %vm333_vm1, %v1621_v49 }
 0xf33   :  { %v1683_v56 = vpop.f32.mrb[20].mxu0 }
 0xf34   :  { %v1684_v57 = vadd.f32 %v1683_v56, %v1612_v55  ;;  %v2190_v58 = vpop.f32.mrb[21].mxu0 }
 0xf35   :  { %v1686_v59 = vpop.f32.mrb[22].mxu0 }
 0xf36   :  { %v1687_v60 = vadd.f32 %v1686_v59, %v1612_v55  ;;  %v2191_v61 = vpop.f32.mrb[23].mxu0  ;;  %v1690_v62 = vmax.f32 %v1684_v57, 0.0 }
 0xf38   :  { %v1691_v63 = vmax.f32 %v1687_v60, 0.0 }
 0xf3a   :  { %v1710_v1 = vpack.c.bf16 %v1691_v63, %v1690_v62 }
 0xf3c   :  { %1835 = vmatmul.mubr.bf16.vlgmr.msra.gmra.mrb[20].mxu1 %v1710_v1 }
0x100f   :  { %v1836_v9 = vpop.f32.mrb[20].mxu1 }
0x1010   :  { %v1837_v10 = vadd.f32 %v1836_v9, %v1715_v7  ;;  %v1838_v11 = vpop.f32.mrb[21].mxu1 }
0x1011   :  { %v1839_v12 = vadd.f32 %v1838_v11, %v1719_v8  ;;  %v1840_v13 = vpop.f32.mrb[22].mxu1 }
0x1012   :  { %v1963_v14 = vmul.f32 -1.442695, %v1837_v10  ;;  %v1841_v15 = vadd.f32 %v1840_v13, %v1715_v7  ;;  %v1842_v16 = vpop.f32.mrb[23].mxu1 }
0x1013   :  { %v1964_v17 = vmul.f32 -1.442695, %v1839_v12  ;;  %v1843_v18 = vadd.f32 %v1842_v16, %v1719_v8 }
0x1014   :  { %2304 = vpow2.f32 %v1963_v14  ;;  %v1965_v19 = vmul.f32 -1.442695, %v1841_v15 }
0x1015   :  { %2306 = vpow2.f32 %v1964_v17  ;;  %v1966_v20 = vmul.f32 -1.442695, %v1843_v18 }
0x1016   :  { %2308 = vpow2.f32 %v1965_v19 }
0x1017   :  { %2310 = vpow2.f32 %v1966_v20 }
0x101e   :  { %v2305_v21 = vpop.eup %2304 }
0x101f   :  { %v2307_v22 = vpop.eup %2306  ;;  %v1857_v23 = vadd.f32 1.0, %v2305_v21 }
0x1020   :  { %v2309_v24 = vpop.eup %2308  ;;  %v1858_v25 = vadd.f32 1.0, %v2307_v22 }
0x1021   :  { %v2311_v26 = vpop.eup %2310  ;;  %2312 = vrcp.f32 %v1857_v23  ;;  %v1859_v27 = vadd.f32 1.0, %v2309_v24 }
0x1022   :  { %2314 = vrcp.f32 %v1858_v25  ;;  %v1860_v28 = vadd.f32 1.0, %v2311_v26 }
0x1023   :  { %2316 = vrcp.f32 %v1859_v27 }
0x1024   :  { %2318 = vrcp.f32 %v1860_v28 }
0x102b   :  { %v2313_v29 = vpop.eup %2312 }
0x102c   :  { %v2315_v30 = vpop.eup %2314  ;;  %1869 = vst [vmem:[%s2649_s6] sm:$0xff] %v2313_v29 }
0x102d   :  { %v2317_v31 = vpop.eup %2316  ;;  %1870 = vst [vmem:[%s2649_s6 + $0x8] sm:$0xff] %v2315_v30 }
0x102e   :  { %v2319_v32 = vpop.eup %2318  ;;  %1871 = vst [vmem:[%s2649_s6 + $0x10] sm:$0xff] %v2317_v31 }
0x102f   :  { %1872 = vst [vmem:[%s2649_s6 + $0x18] sm:$0xff] %v2319_v32 }
0x1030   :  { %1881 = vsyncpa [#allocation3], 1 }

</bundles_post_ra>
